<compile_context>
chip_gen: v7x
topology: tpu7x:2x2x1
jax: 0.10.0
libtpu: 0.0.40
codegen_flags: <defaults>
</compile_context>

<pallas_src>
import jax
import jax.numpy as jnp
from jax.experimental import pallas as pl
from jax.experimental.pallas import tpu as pltpu


# Per-block element budget, expressed as ~4 MiB of f32 (the in-kernel temporaries are
# f32 regardless of the input dtype, so sizing in elements also handles bf16 inputs).
_BLOCK_ELEM_BUDGET = (4 << 20) // 4
_VMEM_LIMIT_BYTES = 48 << 20  # < 64 MiB physical on v7x; raises v5e's 16 MiB default.


def _l2_normalize_kernel(x_ref, o_ref):
    # Works for both block layouts (channel axis is axis=1 in both):
    #   packed : (1, C, TILE_R, 128) -> C is a major axis; the reduce is a plain VPU
    #            accumulation of lane-dense (TILE_R, 128) slices.
    #   generic: (1, C, TILE_P)      -> C on sublanes (XLU sublane reduce).
    x = x_ref[...].astype(jnp.float32)
    ssq = jnp.sum(x * x, axis=1, keepdims=True)
    # torch: qn = norm(x, p=2, dim=1) + 1e-12;  out = x / qn
    # One reciprocal per *pixel* (not per channel*pixel), then a broadcast multiply.
    inv = pl.reciprocal(jnp.sqrt(ssq) + 1e-12, approx=False)
    o_ref[...] = (x * inv).astype(o_ref.dtype)


def _pick_tile(total, per_unit_elems, min_step, n_batch):
    """Tile for the streamed axis: a multiple of `min_step` (or the full axis if it is
    shorter), sized so tile * per_unit_elems ~= _BLOCK_ELEM_BUDGET, and capped so a
    single-sample call still exposes >= 2 grid steps (v7x megacore)."""
    if total <= min_step:
        return total
    tile = max(min_step,
               (_BLOCK_ELEM_BUDGET // (per_unit_elems * min_step)) * min_step)
    full = -(-total // min_step) * min_step          # round_up(total, min_step)
    tile = min(tile, full)
    if n_batch == 1 and tile >= total:
        # Split so both TensorCores get work when the batch axis can't provide it.
        half = -(-((total + 1) // 2) // min_step) * min_step
        tile = max(min_step, min(tile, half))
    return tile


@jax.jit
def normalize(x):
    """Pallas equivalent of Normalize.forward for NCHW input."""
    N, C, H, W = x.shape
    HW = H * W

    # Guard: even the minimum-lane block must hold the whole channel axis.
    # TODO(synk): for very large C add a C-tiled reduction grid axis ('arbitrary'
    # semantics + VMEM accumulator) instead of asserting.
    assert C * 8 * 128 <= _BLOCK_ELEM_BUDGET, "channel dim too large for single-block reduce"

    compiler_params = pltpu.CompilerParams(
        dimension_semantics=("parallel", "parallel"),
        vmem_limit_bytes=_VMEM_LIMIT_BYTES,
    )

    if HW % 128 == 0:
        # Packed path: pixels -> (rows, 128).  Lanes always full; sublanes full too
        # because C is a major axis of the block.
        R = HW // 128
        xr = x.reshape(N, C, R, 128)                  # free reshape, NCHW layout kept
        tile_r = _pick_tile(R, C * 128, 8, N)
        grid = (N, pl.cdiv(R, tile_r))
        out = pl.pallas_call(
            _l2_normalize_kernel,
            out_shape=jax.ShapeDtypeStruct((N, C, R, 128), x.dtype),
            grid_spec=pltpu.PrefetchScalarGridSpec(
                num_scalar_prefetch=0,
                grid=grid,
                in_specs=[pl.BlockSpec((1, C, tile_r, 128),
                                       lambda n, r: (n, 0, r, 0))],
                out_specs=pl.BlockSpec((1, C, tile_r, 128),
                                       lambda n, r: (n, 0, r, 0)),
            ),
            compiler_params=compiler_params,
        )(xr)
    else:
        # Generic path: pixels on lanes, channels on sublanes.  tile_p is always a
        # 128 multiple; the tail block is padded on read and masked on write, and the
        # per-pixel math cannot leak padding garbage into valid columns.
        xr = x.reshape(N, C, HW)
        tile_p = _pick_tile(HW, C, 128, N)
        grid = (N, pl.cdiv(HW, tile_p))
        out = pl.pallas_call(
            _l2_normalize_kernel,
            out_shape=jax.ShapeDtypeStruct((N, C, HW), x.dtype),
            grid_spec=pltpu.PrefetchScalarGridSpec(
                num_scalar_prefetch=0,
                grid=grid,
                in_specs=[pl.BlockSpec((1, C, tile_p), lambda n, p: (n, 0, p))],
                out_specs=pl.BlockSpec((1, C, tile_p), lambda n, p: (n, 0, p)),
            ),
            compiler_params=compiler_params,
        )(xr)

    return out.reshape(N, C, H, W)


def _reference(x):
    xf = x.astype(jnp.float32)
    qn = jnp.sqrt(jnp.sum(xf * xf, axis=1, keepdims=True)) + 1e-12
    return (xf / qn).astype(x.dtype)


if __name__ == "__main__":
    key = jax.random.PRNGKey(0)
    N, C, H, W = 2, 4, 16, 16
    x = jax.random.normal(key, (N, C, H, W), dtype=jnp.float32)

    y = normalize(x)
    jax.block_until_ready(y)

    ref = _reference(x)
    assert y.shape == x.shape
    assert jnp.allclose(y, ref, rtol=1e-5, atol=1e-6), float(jnp.max(jnp.abs(y - ref)))

    print("KERNEL_OK")
</pallas_src>

<mosaic_0001>
module attributes {stable_mosaic.version = 11 : i64} {
  func.func @_l2_normalize_kernel(%arg0: i32, %arg1: i32, %arg2: memref<1x4x2x128xf32, #tpu.memory_space<vmem>>, %arg3: memref<1x4x2x128xf32, #tpu.memory_space<vmem>>) attributes {dimension_semantics = [#tpu.dimension_semantics<parallel>, #tpu.dimension_semantics<parallel>], iteration_bounds = array<i64: 2, 1>, scalar_prefetch = 0 : i64, scratch_operands = 0 : i64, tpu.core_type = #tpu.core_type<tc>, window_params = [{transform_indices = @transform_0, window_bounds = array<i64: 1, 4, 2, 128>}, {transform_indices = @transform_1, window_bounds = array<i64: 1, 4, 2, 128>}]} {
    %c0 = arith.constant 0 : index
    %c0_0 = arith.constant 0 : index
    %c0_1 = arith.constant 0 : index
    %c0_2 = arith.constant 0 : index
    %0 = vector.load %arg2[%c0, %c0_0, %c0_1, %c0_2] : memref<1x4x2x128xf32, #tpu.memory_space<vmem>>, vector<1x4x2x128xf32>
    %1 = arith.mulf %0, %0 : vector<1x4x2x128xf32>
    %cst = arith.constant dense<0.000000e+00> : vector<1x2x128xf32>
    %2 = vector.multi_reduction <add>, %1, %cst [1] : vector<1x4x2x128xf32> to vector<1x2x128xf32>
    %3 = vector.shape_cast %2 : vector<1x2x128xf32> to vector<1x1x2x128xf32>
    %4 = math.sqrt %3 : vector<1x1x2x128xf32>
    %cst_3 = arith.constant 9.99999996E-13 : f32
    %5 = vector.broadcast %cst_3 : f32 to vector<1x1x2x128xf32>
    %6 = arith.addf %4, %5 : vector<1x1x2x128xf32>
    %7 = tpu.reciprocal %6 : vector<1x1x2x128xf32> -> vector<1x1x2x128xf32>
    %8 = vector.broadcast %7 : vector<1x1x2x128xf32> to vector<1x4x2x128xf32>
    %9 = arith.mulf %0, %8 : vector<1x4x2x128xf32>
    %c0_4 = arith.constant 0 : index
    %c0_5 = arith.constant 0 : index
    %c0_6 = arith.constant 0 : index
    %c0_7 = arith.constant 0 : index
    %10 = vector.load %arg3[%c0_4, %c0_5, %c0_6, %c0_7] : memref<1x4x2x128xf32, #tpu.memory_space<vmem>>, vector<1x4x2x128xf32>
    tpu.vector_store %arg3[%c0_4, %c0_5, %c0_6, %c0_7], %9 {strides = array<i32>} : memref<1x4x2x128xf32, #tpu.memory_space<vmem>>, vector<1x4x2x128xf32>,
    return
  }
  func.func @transform_0(%arg0: i32, %arg1: i32) -> (i32, i32, i32, i32) {
    %c0_i32 = arith.constant 0 : i32
    %c0_i32_0 = arith.constant 0 : i32
    %c0_i32_1 = arith.constant 0 : i32
    return %arg0, %c0_i32, %arg1, %c0_i32_0 : i32, i32, i32, i32
  }
  func.func @transform_1(%arg0: i32, %arg1: i32) -> (i32, i32, i32, i32) {
    %c0_i32 = arith.constant 0 : i32
    %c0_i32_0 = arith.constant 0 : i32
    %c0_i32_1 = arith.constant 0 : i32
    return %arg0, %c0_i32, %arg1, %c0_i32_0 : i32, i32, i32, i32
  }
}

</mosaic_0001>

<bundles_post_ra>
// kernel: normalize.1
= control target key start
LH: loop header
LB: loop body
LE: loop exit
PB: predicated region body
PF: predicated region fallthrough
CT: control target
= control target key end

     0   :  { %s339_s6 = smov 0   ;;  %s341_s7 = smov 0   ;;  %s379_s0 = inlined_call_operand.vmem [shape: f32[2,4,2,128], index: 0, kind: input, shape index: {}]   ;;  %s380_s1 = inlined_call_operand.vmem [shape: f32[2,4,2,128], index: 1, kind: output, shape index: {}]  }
   0x1   :  { %s343_s8 = smov 0  }
   0x2 LB: > { %s23_s9 = sadd.s32 1, %s323_s7  ;;  %p268_p0 = scmp.ge.s32.totalorder %s327_s8, 1  ;;  %s327_s8 = sphi %s343_s8, %s11_s8   ;;  %s323_s7 = sphi %s341_s7, %s382_s7   ;;  %s319_s6 = sphi %s339_s6, %s381_s6  }
   0x3   : > { %p25_p1 = scmp.ge.s32.totalorder %s23_s9, 2  ;;  %p106_p2 = scmp.lt.s32.totalorder %s327_s8, 3 }
   0x5   : > { %s384_s9 = smov (%p25_p1, %s23_s9), 0  ;;  %p107_p3 = pnand %p268_p0, %p106_p2 }
   0x6   : > { %p132_p4 = scmp.lt.s32.totalorder (!%p107_p3), %s319_s6, 1  ;;  %vm156_vm0 = vcmask (!%p107_p3), 1041408  }
   0x7   : > { %110 = sbr.rel (%p107_p3) target bundleno = 59 (0x3b), region = 24 }
   0xe   : > { %s386_s6 = smov (!%p132_p4, %s319_s6), 1 }
   0xf   : > { %s275_s10 = sshll.u32 %s386_s6, 3 }
  0x10   : > { %s139_s13 = scalar_lea.vmem %s379_s0, %s275_s10  ;;  %s147_s16 = scalar_lea.vmem %s380_s1, %s275_s10 }
  0x11   : > { %v148_v0 = vld [vmem:[%s139_s13] sm:$0x3]  ;;  %v149_v1 = vld [vmem:[%s139_s13 + $0x2] sm:$0x3]  ;;  %v150_v2 = vld [vmem:[%s139_s13 + $0x4] sm:$0x3] }
  0x12   : > { %v151_v3 = vld [vmem:[%s139_s13 + $0x6] sm:$0x3]  ;;  %v152_v4 = vmul.f32 %v148_v0, %v148_v0  ;;  %v153_v5 = vmul.f32 %v149_v1, %v149_v1  ;;  %v154_v6 = vmul.f32 %v150_v2, %v150_v2 }
  0x13   : > { %v155_v7 = vmul.f32 %v151_v3, %v151_v3 }
  0x14   : > { %v157_v8 = vsel %vm156_vm0, %v152_v4, 0.0  ;;  %v158_v9 = vsel %vm156_vm0, %v153_v5, 0.0  ;;  %v160_v10 = vsel %vm156_vm0, %v154_v6, 0.0 }
  0x15   : > { %v159_v11 = vadd.f32 %v158_v9, %v157_v8  ;;  %v162_v12 = vsel %vm156_vm0, %v155_v7, 0.0 }
  0x17   : > { %v161_v13 = vadd.f32 %v160_v10, %v159_v11 }
  0x19   : > { %v163_v14 = vadd.f32 %v162_v12, %v161_v13 }
  0x1b   : > { %301 = vrsqrt.f32 %v163_v14  ;;  %vm166_vm1 = vcmp.eq.f32.partialorder %v163_v14, inf  ;;  %v169_v16 = vand.u32 2147483648, %v163_v14  ;;  %vm168_vm2 = vcmp.eq.f32.partialorder %v163_v14, 0.0 }
  0x25   : > { %v302_v15 = vpop.eup %301 }
  0x26   : > { %v165_v17 = vmul.f32 %v302_v15, %v163_v14 }
  0x28   : > { %v167_v18 = vsel %vm166_vm1, %v163_v14, %v165_v17 }
  0x29   : > { %v170_v19 = vsel %vm168_vm2, %v169_v16, %v167_v18 }
  0x2a   : > { %v171_v20 = vadd.f32 1e-12, %v170_v19 }
  0x2c   : > { %303 = vrcp.f32 %v171_v20 }
  0x36   : > { %v304_v21 = vpop.eup %303 }
  0x37   : > { %v173_v22 = vmul.f32 %v304_v21, %v148_v0  ;;  %v174_v23 = vmul.f32 %v304_v21, %v149_v1  ;;  %v175_v24 = vmul.f32 %v304_v21, %v150_v2  ;;  %v176_v25 = vmul.f32 %v304_v21, %v151_v3 }
  0x39   : > { %177 = vst [vmem:[%s147_s16] sm:$0x3] %v173_v22  ;;  %178 = vst [vmem:[%s147_s16 + $0x2] sm:$0x3] %v174_v23 }
  0x3a   : > { %179 = vst [vmem:[%s147_s16 + $0x4] sm:$0x3] %v175_v24  ;;  %180 = vst [vmem:[%s147_s16 + $0x6] sm:$0x3] %v176_v25 }
  0x3b PF: > { %s11_s8 = sadd.s32 1, %s327_s8   ;;  %s381_s6 = smov %s323_s7 }
  0x3c   : > { %p8_p5 = scmp.ge.s32.totalorder %s11_s8, 4   ;;  %s382_s7 = smov %s384_s9 }
  0x3e   :  { %10 = sbr.rel (!%p8_p5) target bundleno = 2 (0x2), region = 54 }

</bundles_post_ra>
